<compile_context>
chip_gen: v7x
topology: tpu7x:2x2x1
jax: 0.10.0
libtpu: 0.0.40
codegen_flags: <defaults>
</compile_context>

<pallas_src>
import jax
import jax.numpy as jnp
from jax.experimental import pallas as pl
from jax.experimental.pallas import tpu as pltpu


def make_sinusoid_table(n_position: int, d_hid: int) -> jnp.ndarray:
    """Deterministic sinusoid position encoding table, shape [n_position, d_hid]."""
    pos = jnp.arange(n_position, dtype=jnp.float32)[:, None]            # [P, 1]
    hid = jnp.arange(d_hid, dtype=jnp.float32)[None, :]                 # [1, D]
    # exponent uses 2*(hid_j // 2)/d_hid, matching the PyTorch reference
    div = jnp.power(10000.0, 2.0 * jnp.floor(hid / 2.0) / d_hid)         # [1, D]
    angles = pos / div                                                    # [P, D]
    even_mask = (jnp.arange(d_hid) % 2 == 0)[None, :]
    return jnp.where(even_mask, jnp.sin(angles), jnp.cos(angles)).astype(jnp.float32)


def _pos_add_kernel(x_ref, pos_ref, o_ref):
    # x_ref / o_ref: (TB, TR, Ccols); pos_ref: (TR, Ccols) shared across batch.
    # Broadcast over the leading batch-tile dim is free VPU work (HBM bound).
    o_ref[...] = (x_ref[...] + pos_ref[...]).astype(o_ref.dtype)


def _choose_layout(n: int, c: int):
    """Lane-dense per-batch 2D layout [R, Ccols]; returns (R, Ccols, lane_pad)."""
    if c % 128 == 0:
        return n, c, 0
    if (n * c) % 128 == 0:
        return (n * c) // 128, 128, 0
    # Rare fallback: pad the hidden dim to the next multiple of 128 so stores
    # are full-vreg unmasked vst (masked vst.msk is up to ~4.5x slower).
    pad = (-c) % 128
    return n, c + pad, pad


# ~4 MiB per x tile: ~86% of measured HBM roofline on a streaming add, while
# 2x(x) + 2x(out) + 2x(pos) stays <= ~24 MiB -> comfortable even on v7x (64 MiB).
_TARGET_TILE_BYTES = 4 << 20


def _choose_tiles(b: int, r: int, ccols: int, itemsize: int):
    """Pick (TB, TR) so TB*TR*Ccols ~ target; TR is a sublane multiple or full R."""
    sub = max(8, 32 // itemsize)                 # 8 for f32, 16 for bf16, 32 for i8
    row_bytes = ccols * itemsize
    rows_target = max(1, _TARGET_TILE_BYTES // row_bytes)
    if r <= rows_target:
        tr = r                                   # full-extent rows block (always legal)
        tb = max(1, min(b, rows_target // max(1, r)))   # amortize fixed step cost
    else:
        tr = min(r, max(sub, (rows_target // sub) * sub))
        tb = 1
    return tb, tr


class PositionalEncoding:
    """JAX/Pallas port of the PyTorch PositionalEncoding module."""

    def __init__(self, d_hid: int, n_position: int = 200):
        self.d_hid = d_hid
        self.n_position = n_position
        self.pos_table = make_sinusoid_table(n_position, d_hid)   # fp32 buffer [P, D]
        self._prepared = {}   # (N, dtype) -> lane-dense pos slab [R, Ccols]

    def _prepared_pos(self, n: int, dtype) -> jnp.ndarray:
        key = (n, jnp.dtype(dtype).str)
        if key not in self._prepared:
            r, ccols, pad = _choose_layout(n, self.d_hid)
            # NOTE: casting the fp32 table to the activation dtype halves HBM
            # traffic for bf16 activations; for sub-fp32 inputs this differs
            # slightly from PyTorch's promote-to-fp32 add (fp32 path identical).
            pos = self.pos_table[:n, :].astype(dtype)
            if pad:
                pos = jnp.pad(pos, ((0, 0), (0, pad)))
            self._prepared[key] = pos.reshape(r, ccols)
        return self._prepared[key]

    def __call__(self, x: jnp.ndarray) -> jnp.ndarray:
        b, n, c = x.shape
        if c != self.d_hid or n > self.n_position:
            raise ValueError(
                f"input [B={b}, N={n}, C={c}] incompatible with "
                f"d_hid={self.d_hid}, n_position={self.n_position}")

        r, ccols, pad = _choose_layout(n, c)
        pos2 = self._prepared_pos(n, x.dtype)              # hoisted out of hot path

        if pad:
            x = jnp.pad(x, ((0, 0), (0, 0), (0, pad)))
        x2 = x.reshape(b, r, ccols)

        itemsize = jnp.dtype(x.dtype).itemsize
        tb, tr = _choose_tiles(b, r, ccols, itemsize)
        # Batch axis innermost -> pos block index constant across the inner
        # batch iterations, so the positional tile is not re-fetched from HBM.
        grid = (pl.cdiv(r, tr), pl.cdiv(b, tb))

        # Double-buffered footprint: x + out tiles (TB,TR,C) and pos (TR,C).
        footprint = 2 * (2 * tb + 1) * tr * ccols * itemsize
        vmem_limit = int(min(48 << 20, max(2 * footprint, 32 << 20)))

        out2 = pl.pallas_call(
            _pos_add_kernel,
            out_shape=jax.ShapeDtypeStruct((b, r, ccols), x.dtype),
            grid_spec=pltpu.PrefetchScalarGridSpec(
                num_scalar_prefetch=0,
                grid=grid,
                in_specs=[
                    pl.BlockSpec((tb, tr, ccols), lambda ri, bi: (bi, ri, 0)),
                    pl.BlockSpec((tr, ccols), lambda ri, bi: (ri, 0)),
                ],
                out_specs=pl.BlockSpec((tb, tr, ccols), lambda ri, bi: (bi, ri, 0)),
            ),
            input_output_aliases={0: 0},
            compiler_params=pltpu.CompilerParams(
                dimension_semantics=("parallel", "parallel"),
                vmem_limit_bytes=vmem_limit,
            ),
        )(x2, pos2)

        if pad:
            return out2.reshape(b, n, ccols)[:, :, :c]
        return out2.reshape(b, n, c)


if __name__ == "__main__":
    key = jax.random.PRNGKey(0)
    B, N, C = 2, 8, 32            # small shapes consistent with forward([bs, N, C])
    n_position = 200

    x = jax.random.normal(key, (B, N, C), dtype=jnp.float32)

    pe = PositionalEncoding(d_hid=C, n_position=n_position)   # buffer built once

    # pure-JAX reference (computed before the kernel call; kernel may alias x2)
    ref = x + pe.pos_table[None, :N, :]

    out = pe(x)
    out = jax.block_until_ready(out)

    assert out.shape == (B, N, C)
    assert jnp.allclose(out, ref, atol=1e-6), "mismatch vs reference"

    print("KERNEL_OK")
</pallas_src>

<mosaic_0001>
module attributes {stable_mosaic.version = 11 : i64} {
  func.func @_pos_add_kernel(%arg0: i32, %arg1: i32, %arg2: memref<2x2x128xf32, #tpu.memory_space<vmem>>, %arg3: memref<2x128xf32, #tpu.memory_space<vmem>>, %arg4: memref<2x2x128xf32, #tpu.memory_space<vmem>>) attributes {dimension_semantics = [#tpu.dimension_semantics<parallel>, #tpu.dimension_semantics<parallel>], iteration_bounds = array<i64: 1, 1>, scalar_prefetch = 0 : i64, scratch_operands = 0 : i64, tpu.core_type = #tpu.core_type<tc>, window_params = [{transform_indices = @transform_0, window_bounds = array<i64: 2, 2, 128>}, {transform_indices = @transform_1, window_bounds = array<i64: 2, 128>}, {transform_indices = @transform_2, window_bounds = array<i64: 2, 2, 128>}]} {
    %c0 = arith.constant 0 : index
    %c0_0 = arith.constant 0 : index
    %c0_1 = arith.constant 0 : index
    %0 = vector.load %arg2[%c0, %c0_0, %c0_1] : memref<2x2x128xf32, #tpu.memory_space<vmem>>, vector<2x2x128xf32>
    %c0_2 = arith.constant 0 : index
    %c0_3 = arith.constant 0 : index
    %1 = vector.load %arg3[%c0_2, %c0_3] : memref<2x128xf32, #tpu.memory_space<vmem>>, vector<2x128xf32>
    %2 = vector.shape_cast %1 : vector<2x128xf32> to vector<1x2x128xf32>
    %3 = vector.broadcast %2 : vector<1x2x128xf32> to vector<2x2x128xf32>
    %4 = arith.addf %0, %3 : vector<2x2x128xf32>
    %c0_4 = arith.constant 0 : index
    %c0_5 = arith.constant 0 : index
    %c0_6 = arith.constant 0 : index
    %5 = vector.load %arg4[%c0_4, %c0_5, %c0_6] : memref<2x2x128xf32, #tpu.memory_space<vmem>>, vector<2x2x128xf32>
    tpu.vector_store %arg4[%c0_4, %c0_5, %c0_6], %4 {strides = array<i32>} : memref<2x2x128xf32, #tpu.memory_space<vmem>>, vector<2x2x128xf32>,
    return
  }
  func.func @transform_0(%arg0: i32, %arg1: i32) -> (i32, i32, i32) {
    %c0_i32 = arith.constant 0 : i32
    %c0_i32_0 = arith.constant 0 : i32
    return %arg1, %arg0, %c0_i32 : i32, i32, i32
  }
  func.func @transform_1(%arg0: i32, %arg1: i32) -> (i32, i32) {
    %c0_i32 = arith.constant 0 : i32
    %c0_i32_0 = arith.constant 0 : i32
    return %arg0, %c0_i32 : i32, i32
  }
  func.func @transform_2(%arg0: i32, %arg1: i32) -> (i32, i32, i32) {
    %c0_i32 = arith.constant 0 : i32
    %c0_i32_0 = arith.constant 0 : i32
    return %arg1, %arg0, %c0_i32 : i32, i32, i32
  }
}

</mosaic_0001>

<bundles_post_ra>
// kernel: tpu_custom_call.1
= control target key start
LH: loop header
LB: loop body
LE: loop exit
PB: predicated region body
PF: predicated region fallthrough
CT: control target
= control target key end

     0   :  { %7 = vsyncpa [#allocation3], 0  ;;  %s154_s0 = inlined_call_operand.hbm [shape: f32[2,2,128], index: 0, kind: input, shape index: {}, may-alias: {0,2}]   ;;  %s155_s1 = inlined_call_operand.vmem [shape: f32[2,128], index: 1, kind: input, shape index: {}]   ;;  %s156_s2 = inlined_call_operand.hbm [shape: f32[2,2,128], index: 2, kind: output, shape index: {}, may-alias: {0,2}]  }
   0x1   :  { %8 = vsyncpa [#allocation4], 0  ;;  %s102_s9 = smov [#allocation2]   ;;  %s54_s13 = scalar_lea.hbm %s154_s0, 64 }
   0x2   :  { %s14_s10 = sshll.u32 %s102_s9, 4  ;;  %p55_p0 = scmp.ne.s32.totalorder %s154_s0, %s54_s13  ;;  %s15_s10 = int_to_ptr.vmem [resolvable:$true] %s14_s10 }
   0x3   :  { %p58_p1 = scmp.lt.u32.totalorder %s54_s13, %s154_s0 }
   0x5   :  { %p60_p2 = pnand %p58_p1, %p55_p0 }
   0x7   :  { %63 = shalt.err (!%p60_p2)
}
   0x8   :  { %s64_s18 = scalar_lea.vmem %s15_s10, 64  ;;  %p69_p4 = scmp.lt.s32.totalorder %s15_s10, %s15_s10 }
   0x9   :  { %p65_p3 = scmp.ne.s32.totalorder %s15_s10, %s64_s18  ;;  %p70_p5 = scmp.lt.s32.totalorder %s64_s18, %s64_s18 }
   0xb   :  { %p71_p6 = por %p70_p5, %p69_p4 }
   0xd   :  { %p72_p7 = pnand %p71_p6, %p65_p3 }
   0xf   :  { %75 = shalt.err (!%p72_p7)
}
  0x10   :  { %s103_s19 = smov 32   ;;  %s104_s20 = smov 2  }
  0x11   :  { %20 = dma.hbm_to_vmem [thread:$0]  %s154_s0, 64, %s15_s10, [#allocation3], %s103_s19, %s103_s19, %s104_s20  }
  0x12   :  { %98 = dma.done.wait [#allocation3], 64  }
  0x13   :  { %99 = vsyncadd [#allocation3], 4294967232  ;;  %s105_s23 = smov [#allocation5]   ;;  %v26_v0 = vld [vmem:[#allocation2] sm:$0x3] }
  0x14   :  { %s38_s24 = sshll.u32 %s105_s23, 4  ;;  %v28_v1 = vld [vmem:[%s155_s1] sm:$0x3]  ;;  %v27_v2 = vld [vmem:[#allocation2 + $0x2] sm:$0x3]  ;;  %s39_s24 = int_to_ptr.vmem [resolvable:$true] %s38_s24 }
  0x15   :  { %v29_v3 = vadd.f32 %v28_v1, %v26_v0  ;;  %v30_v4 = vadd.f32 %v28_v1, %v27_v2  ;;  %s76_s27 = scalar_lea.vmem %s39_s24, 64  ;;  %p81_p9 = scmp.lt.s32.totalorder %s39_s24, %s39_s24 }
  0x16   :  { %p77_p8 = scmp.ne.s32.totalorder %s39_s24, %s76_s27  ;;  %p82_p10 = scmp.lt.s32.totalorder %s76_s27, %s76_s27 }
  0x17   :  { %31 = vst [vmem:[#allocation5] sm:$0x3] %v29_v3  ;;  %32 = vst [vmem:[#allocation5 + $0x2] sm:$0x3] %v30_v4 }
  0x18   :  { %p83_p11 = por %p82_p10, %p81_p9 }
  0x1a   :  { %p84_p12 = pnand %p83_p11, %p77_p8 }
  0x1c   :  { %87 = shalt.err (!%p84_p12)
}
  0x1d   :  { %s88_s29 = scalar_lea.hbm %s156_s2, 64 }
  0x1e   :  { %p89_p13 = scmp.ne.s32.totalorder %s156_s2, %s88_s29  ;;  %p92_p0 = scmp.lt.u32.totalorder %s88_s29, %s156_s2 }
  0x20   :  { %p94_p1 = pnand %p92_p0, %p89_p13 }
  0x22   :  { %97 = shalt.err (!%p94_p1)
}
  0x23   :  { %44 = dma.vmem_to_hbm [thread:$0]  %s39_s24, 64, %s156_s2, [#allocation4], %s103_s19, %s103_s19, %s104_s20  }
  0x24   :  { %100 = dma.done.wait [#allocation4], 64  }
  0x25   :  { %101 = vsyncadd [#allocation4], 4294967232 }
  0x26   :  { %48 = vsyncpa [#allocation3], 1 }
  0x27   :  { %49 = vsyncpa [#allocation4], 1 }

</bundles_post_ra>
